<compile_context>
chip_gen: v7x
topology: tpu7x:2x2x1
jax: 0.10.0
libtpu: 0.0.40
codegen_flags: <defaults>
</compile_context>

<pallas_src>
import jax
import jax.numpy as jnp
from jax.experimental import pallas as pl
from jax.experimental.pallas import tpu as pltpu


def make_cnn_kernel(L_out: int, L1: int, L2: int, fs_max: int, F: int, Fp: int):
    """Fused im2col-conv + bias + ReLU + masked max-pool + FC kernel."""

    def kernel(emb_ref, w_ref, b_ref, wfc_ref, bfc_ref, out_ref):
        emb = emb_ref[...]                                   # (TB, S_pad, E) bf16
        TB = emb.shape[0]
        E = emb.shape[-1]

        # im2col: build ONE lane-dense (TB*L_out, fs_max*E) operand instead of
        # fs small K=E matmuls per branch.
        cols = jnp.concatenate(
            [emb[:, k:k + L_out, :] for k in range(fs_max)], axis=-1
        )                                                    # (TB, L_out, fs_max*E)
        a = cols.reshape(TB * L_out, fs_max * E)             # bf16, B folded to sublanes

        # Single fused MXU matmul for BOTH conv branches: K = fs_max*E, N = Fp.
        h = jnp.dot(a, w_ref[...], preferred_element_type=jnp.float32)

        # Bias + ReLU in f32 on the VPU (bias of the padded lanes is zero).
        h = jnp.maximum(h + b_ref[...], 0.0)                 # (TB*L_out, Fp)
        h = h.reshape(TB, L_out, Fp)

        # Mask conv positions whose window spills into the zero seq padding
        # (only the longer-filter branch has fewer valid positions) to -inf so
        # they can never win the global max pool.
        pos = jax.lax.broadcasted_iota(jnp.int32, (L_out, Fp), 0)
        col = jax.lax.broadcasted_iota(jnp.int32, (L_out, Fp), 1)
        limit = jnp.where(col < F, L1, L2)                   # per-branch valid length
        h = jnp.where((pos < limit)[None, :, :], h, -jnp.inf)

        p = jnp.max(h, axis=1)                               # global max pool (TB, Fp)

        # N=1 FC as a VPU multiply + lane reduce (no MXU push for a dot with
        # a single output column).  Padded lanes of wfc are zero.
        out_ref[...] = (
            jnp.sum(p * wfc_ref[...], axis=-1, keepdims=True) + bfc_ref[...]
        )                                                    # (TB, 1)

    return kernel


def init_params(key, vocab_size, embedding_dim, n_filters, filter_sizes):
    k_emb, k_w1, k_b1, k_w2, k_b2, k_wfc, k_bfc = jax.random.split(key, 7)
    fs1, fs2 = filter_sizes
    params = {
        # nn.Embedding(len(vocab), embedding_dim)
        "embedding": jax.random.normal(k_emb, (vocab_size, embedding_dim),
                                       jnp.float32),
        # nn.Conv2d(1, F, kernel=(fs, E)) weight (F, 1, fs, E) stored as (fs, E, F)
        "w1": 0.1 * jax.random.normal(k_w1, (fs1, embedding_dim, n_filters),
                                      jnp.float32),
        "b1": 0.1 * jax.random.normal(k_b1, (1, n_filters), jnp.float32),
        "w2": 0.1 * jax.random.normal(k_w2, (fs2, embedding_dim, n_filters),
                                      jnp.float32),
        "b2": 0.1 * jax.random.normal(k_b2, (1, n_filters), jnp.float32),
        # nn.Linear(len(filter_sizes)*50, 1): weight (1, 2F) stored as (2F, 1)
        "wfc": 0.1 * jax.random.normal(k_wfc, (2 * n_filters, 1), jnp.float32),
        "bfc": 0.1 * jax.random.normal(k_bfc, (1, 1), jnp.float32),
    }
    return params


def fuse_params(params, filter_sizes):
    """One-time repack of weights into the fused / lane-padded kernel layout."""
    fs1, fs2 = filter_sizes
    fs_max = max(fs1, fs2)
    E = params["w1"].shape[1]
    F = params["w1"].shape[2]
    K_full = fs_max * E
    Fp = ((2 * F + 127) // 128) * 128                        # pad 2F -> lane multiple

    w1 = params["w1"].reshape(fs1 * E, F)                    # row index = k*E + e
    w2 = params["w2"].reshape(fs2 * E, F)
    w_fused = jnp.zeros((K_full, Fp), jnp.float32)
    w_fused = w_fused.at[:fs1 * E, :F].set(w1)               # branch 1 -> cols [0, F)
    w_fused = w_fused.at[:fs2 * E, F:2 * F].set(w2)          # branch 2 -> cols [F, 2F)

    b_fused = jnp.zeros((1, Fp), jnp.float32)
    b_fused = b_fused.at[0, :F].set(params["b1"][0])
    b_fused = b_fused.at[0, F:2 * F].set(params["b2"][0])

    wfc_row = jnp.zeros((1, Fp), jnp.float32)
    wfc_row = wfc_row.at[0, :2 * F].set(params["wfc"][:, 0])

    return {
        "embedding": params["embedding"],
        "w_fused": w_fused.astype(jnp.bfloat16),             # bf16 MXU operand
        "b_fused": b_fused,
        "wfc_row": wfc_row,
        "bfc": params["bfc"],
        "n_filters": F,
    }


def cnn_forward(x_tokens, fused, filter_sizes):
    """x_tokens: (seq_len, batch) int32 token ids, matching the PyTorch input."""
    fs1, fs2 = filter_sizes
    fs_min, fs_max = min(fs1, fs2), max(fs1, fs2)

    x = jnp.transpose(x_tokens, (1, 0))                      # (B, S)
    B, S = x.shape
    # Embedding lookup (gather) is glue; hot path runs in Pallas.
    # TODO(synk): at production B/S, fuse the gather into the kernel via
    # PrefetchScalarGridSpec (token ids as scalar prefetch + DMA row gather)
    # to avoid the HBM round trip of the (B, S, E) activation.
    emb = jnp.take(fused["embedding"], x, axis=0)            # (B, S, E) f32
    E = emb.shape[-1]

    L1 = S - fs1 + 1                                         # branch-1 valid length
    L2 = S - fs2 + 1                                         # branch-2 valid length
    L_out = S - fs_min + 1                                   # im2col positions
    S_pad = L_out + fs_max - 1                               # = S + (fs_max - fs_min)
    emb = jnp.pad(emb, ((0, 0), (0, S_pad - S), (0, 0)))
    emb = emb.astype(jnp.bfloat16)                           # halve DMA + vreg footprint

    F = fused["n_filters"]
    Fp = fused["w_fused"].shape[1]
    K_full = fs_max * E

    # Batch grid: trivially (1,) at tiny B; shards across TensorCores for
    # large B.  Tile kept well inside the v7x 64 MiB VMEM budget.
    tb = B if B <= 128 else 128
    assert B % tb == 0, "batch must be a multiple of the batch tile"
    grid = (B // tb,)

    out = pl.pallas_call(
        make_cnn_kernel(L_out, L1, L2, fs_max, F, Fp),
        out_shape=jax.ShapeDtypeStruct((B, 1), jnp.float32),
        grid=grid,
        in_specs=[
            pl.BlockSpec((tb, S_pad, E), lambda i: (i, 0, 0)),
            pl.BlockSpec((K_full, Fp), lambda i: (0, 0)),
            pl.BlockSpec((1, Fp), lambda i: (0, 0)),
            pl.BlockSpec((1, Fp), lambda i: (0, 0)),
            pl.BlockSpec((1, 1), lambda i: (0, 0)),
        ],
        out_specs=pl.BlockSpec((tb, 1), lambda i: (i, 0)),
        compiler_params=pltpu.CompilerParams(
            dimension_semantics=("parallel",)),
    )(emb, fused["w_fused"], fused["b_fused"], fused["wfc_row"], fused["bfc"])
    return out[:, 0]                                         # (B,) like .squeeze(1)


def cnn_forward_ref(x_tokens, params, filter_sizes):
    """Pure-JAX f32 reference mirroring the PyTorch forward."""
    fs1, fs2 = filter_sizes
    x = jnp.transpose(x_tokens, (1, 0))
    emb = jnp.take(params["embedding"], x, axis=0)           # (B, S, E)
    S = emb.shape[1]

    def branch(w, b, fs):
        L = S - fs + 1
        h = sum(jnp.einsum("bse,ef->bsf", emb[:, k:k + L, :], w[k])
                for k in range(fs))
        h = jnp.maximum(h + b[None, :, :], 0.0)
        return jnp.max(h, axis=1)

    p1 = branch(params["w1"], params["b1"], fs1)
    p2 = branch(params["w2"], params["b2"], fs2)
    p = jnp.concatenate([p1, p2], axis=1)
    return (p @ params["wfc"] + params["bfc"])[:, 0]


if __name__ == "__main__":
    # Small shapes consistent with the module (fc1 hardcodes 50 => n_filters=50).
    SEQ_LEN = 16
    BATCH = 2
    EMB_DIM = 32
    VOCAB = 100
    N_FILTERS = 50
    FILTER_SIZES = (3, 4)

    key = jax.random.PRNGKey(0)
    k_params, k_x = jax.random.split(key)

    params = init_params(k_params, VOCAB, EMB_DIM, N_FILTERS, FILTER_SIZES)
    fused = fuse_params(params, FILTER_SIZES)

    # PyTorch forward receives x of shape (seq_len, batch) of token ids.
    x_tokens = jax.random.randint(k_x, (SEQ_LEN, BATCH), 0, VOCAB, jnp.int32)

    out = cnn_forward(x_tokens, fused, FILTER_SIZES)
    out = jax.block_until_ready(out)

    ref = jax.block_until_ready(cnn_forward_ref(x_tokens, params, FILTER_SIZES))
    assert out.shape == (BATCH,), out.shape
    # Tolerance accounts for the bf16 MXU operands (f32 accumulation/epilogue).
    assert jnp.allclose(out, ref, rtol=3e-2, atol=3e-2), (out, ref)

    print("KERNEL_OK")
</pallas_src>

<mosaic_0001>
module attributes {stable_mosaic.version = 11 : i64} {
  func.func @kernel(%arg0: i32, %arg1: memref<2x17x32xbf16, #tpu.memory_space<vmem>>, %arg2: memref<128x128xbf16, #tpu.memory_space<vmem>>, %arg3: memref<1x128xf32, #tpu.memory_space<vmem>>, %arg4: memref<1x128xf32, #tpu.memory_space<vmem>>, %arg5: memref<1x1xf32, #tpu.memory_space<vmem>>, %arg6: memref<2x1xf32, #tpu.memory_space<vmem>>) attributes {dimension_semantics = [#tpu.dimension_semantics<parallel>], iteration_bounds = array<i64: 1>, scalar_prefetch = 0 : i64, scratch_operands = 0 : i64, tpu.core_type = #tpu.core_type<tc>, window_params = [{transform_indices = @transform_0, window_bounds = array<i64: 2, 17, 32>}, {pipeline_mode = #tpu.pipeline_mode<synchronous>, transform_indices = @transform_1, window_bounds = array<i64: 128, 128>}, {pipeline_mode = #tpu.pipeline_mode<synchronous>, transform_indices = @transform_2, window_bounds = array<i64: 1, 128>}, {pipeline_mode = #tpu.pipeline_mode<synchronous>, transform_indices = @transform_3, window_bounds = array<i64: 1, 128>}, {pipeline_mode = #tpu.pipeline_mode<synchronous>, transform_indices = @transform_4, window_bounds = array<i64: 1, 1>}, {transform_indices = @transform_5, window_bounds = array<i64: 2, 1>}]} {
    %c0 = arith.constant 0 : index
    %c0_0 = arith.constant 0 : index
    %c0_1 = arith.constant 0 : index
    %0 = vector.load %arg1[%c0, %c0_0, %c0_1] : memref<2x17x32xbf16, #tpu.memory_space<vmem>>, vector<2x17x32xbf16>
    %1 = vector.extract_strided_slice %0 {offsets = [0, 0, 0], sizes = [2, 14, 32], strides = [1, 1, 1]} : vector<2x17x32xbf16> to vector<2x14x32xbf16>
    %2 = vector.extract_strided_slice %0 {offsets = [0, 1, 0], sizes = [2, 14, 32], strides = [1, 1, 1]} : vector<2x17x32xbf16> to vector<2x14x32xbf16>
    %3 = vector.extract_strided_slice %0 {offsets = [0, 2, 0], sizes = [2, 14, 32], strides = [1, 1, 1]} : vector<2x17x32xbf16> to vector<2x14x32xbf16>
    %4 = vector.extract_strided_slice %0 {offsets = [0, 3, 0], sizes = [2, 14, 32], strides = [1, 1, 1]} : vector<2x17x32xbf16> to vector<2x14x32xbf16>
    %5 = tpu.concatenate %1, %2, %3, %4 in 2 : vector<2x14x32xbf16>, vector<2x14x32xbf16>, vector<2x14x32xbf16>, vector<2x14x32xbf16> -> vector<2x14x128xbf16>
    %6 = vector.shape_cast %5 : vector<2x14x128xbf16> to vector<28x128xbf16>
    %c0_2 = arith.constant 0 : index
    %c0_3 = arith.constant 0 : index
    %7 = vector.load %arg2[%c0_2, %c0_3] : memref<128x128xbf16, #tpu.memory_space<vmem>>, vector<128x128xbf16>
    %cst = arith.constant dense<0.000000e+00> : vector<28x128xf32>
    %8 = tpu.matmul %6, %7, %cst {dimension_numbers = #tpu.dot_dimension_numbers<[1], [0], [0], [1], [0, 0, 1, 1], [], []>} : vector<28x128xbf16>, vector<128x128xbf16>, vector<28x128xf32> -> vector<28x128xf32>
    %c0_4 = arith.constant 0 : index
    %c0_5 = arith.constant 0 : index
    %9 = vector.load %arg3[%c0_4, %c0_5] : memref<1x128xf32, #tpu.memory_space<vmem>>, vector<1x128xf32>
    %10 = vector.broadcast %9 : vector<1x128xf32> to vector<28x128xf32>
    %11 = arith.addf %8, %10 : vector<28x128xf32>
    %cst_6 = arith.constant 0.000000e+00 : f32
    %12 = vector.broadcast %cst_6 : f32 to vector<28x128xf32>
    %13 = arith.maximumf %11, %12 : vector<28x128xf32>
    %14 = vector.shape_cast %13 : vector<28x128xf32> to vector<2x14x128xf32>
    %15 = tpu.iota {dimensions = array<i32: 0>} : vector<14x128xi32>
    %16 = tpu.iota {dimensions = array<i32: 1>} : vector<14x128xi32>
    %c50_i32 = arith.constant 50 : i32
    %17 = vector.broadcast %c50_i32 : i32 to vector<14x128xi32>
    %18 = arith.cmpi slt, %16, %17 : vector<14x128xi32>
    %c14_i32 = arith.constant 14 : i32
    %c13_i32 = arith.constant 13 : i32
    %19 = vector.broadcast %c14_i32 : i32 to vector<14x128xi32>
    %20 = vector.broadcast %c13_i32 : i32 to vector<14x128xi32>
    %21 = arith.select %18, %19, %20 : vector<14x128xi1>, vector<14x128xi32>
    %22 = arith.cmpi slt, %15, %21 : vector<14x128xi32>
    %23 = vector.shape_cast %22 : vector<14x128xi1> to vector<1x14x128xi1>
    %cst_7 = arith.constant 0xFF800000 : f32
    %24 = vector.shape_cast %23 : vector<1x14x128xi1> to vector<1x14x128xi1>
    %25 = vector.broadcast %24 : vector<1x14x128xi1> to vector<2x14x128xi1>
    %26 = vector.broadcast %cst_7 : f32 to vector<2x14x128xf32>
    %27 = arith.select %25, %14, %26 : vector<2x14x128xi1>, vector<2x14x128xf32>
    %cst_8 = arith.constant dense<0xFF800000> : vector<2x128xf32>
    %28 = vector.multi_reduction <maximumf>, %27, %cst_8 [1] : vector<2x14x128xf32> to vector<2x128xf32>
    %c0_9 = arith.constant 0 : index
    %c0_10 = arith.constant 0 : index
    %29 = vector.load %arg4[%c0_9, %c0_10] : memref<1x128xf32, #tpu.memory_space<vmem>>, vector<1x128xf32>
    %30 = vector.broadcast %29 : vector<1x128xf32> to vector<2x128xf32>
    %31 = arith.mulf %28, %30 : vector<2x128xf32>
    %cst_11 = arith.constant dense<0.000000e+00> : vector<2xf32>
    %32 = vector.multi_reduction <add>, %31, %cst_11 [1] : vector<2x128xf32> to vector<2xf32>
    %33 = vector.shape_cast %32 : vector<2xf32> to vector<2x1xf32>
    %c0_12 = arith.constant 0 : index
    %c0_13 = arith.constant 0 : index
    %34 = vector.load %arg5[%c0_12, %c0_13] : memref<1x1xf32, #tpu.memory_space<vmem>>, vector<1x1xf32>
    %35 = vector.broadcast %34 : vector<1x1xf32> to vector<2x1xf32>
    %36 = arith.addf %33, %35 : vector<2x1xf32>
    %c0_14 = arith.constant 0 : index
    %c0_15 = arith.constant 0 : index
    %37 = vector.load %arg6[%c0_14, %c0_15] : memref<2x1xf32, #tpu.memory_space<vmem>>, vector<2x1xf32>
    tpu.vector_store %arg6[%c0_14, %c0_15], %36 {strides = array<i32>} : memref<2x1xf32, #tpu.memory_space<vmem>>, vector<2x1xf32>,
    return
  }
  func.func @transform_0(%arg0: i32) -> (i32, i32, i32) {
    %c0_i32 = arith.constant 0 : i32
    %c0_i32_0 = arith.constant 0 : i32
    %c0_i32_1 = arith.constant 0 : i32
    return %arg0, %c0_i32, %c0_i32_0 : i32, i32, i32
  }
  func.func @transform_1(%arg0: i32) -> (i32, i32) {
    %c0_i32 = arith.constant 0 : i32
    %c0_i32_0 = arith.constant 0 : i32
    %c0_i32_1 = arith.constant 0 : i32
    return %c0_i32, %c0_i32_0 : i32, i32
  }
  func.func @transform_2(%arg0: i32) -> (i32, i32) {
    %c0_i32 = arith.constant 0 : i32
    %c0_i32_0 = arith.constant 0 : i32
    %c0_i32_1 = arith.constant 0 : i32
    return %c0_i32, %c0_i32_0 : i32, i32
  }
  func.func @transform_3(%arg0: i32) -> (i32, i32) {
    %c0_i32 = arith.constant 0 : i32
    %c0_i32_0 = arith.constant 0 : i32
    %c0_i32_1 = arith.constant 0 : i32
    return %c0_i32, %c0_i32_0 : i32, i32
  }
  func.func @transform_4(%arg0: i32) -> (i32, i32) {
    %c0_i32 = arith.constant 0 : i32
    %c0_i32_0 = arith.constant 0 : i32
    %c0_i32_1 = arith.constant 0 : i32
    return %c0_i32, %c0_i32_0 : i32, i32
  }
  func.func @transform_5(%arg0: i32) -> (i32, i32) {
    %c0_i32 = arith.constant 0 : i32
    %c0_i32_0 = arith.constant 0 : i32
    return %arg0, %c0_i32 : i32, i32
  }
}

</mosaic_0001>

<bundles_post_ra>
// kernel: tpu_custom_call.1
= control target key start
LH: loop header
LB: loop body
LE: loop exit
PB: predicated region body
PF: predicated region fallthrough
CT: control target
= control target key end

     0   :  { %s824_s0 = inlined_call_operand.vmem [shape: bf16[2,17,32], index: 0, kind: input, shape index: {}]   ;;  %s825_s1 = inlined_call_operand.hbm [shape: bf16[128,128], index: 1, kind: input, shape index: {}]   ;;  %s826_s2 = inlined_call_operand.vmem [shape: f32[1,128], index: 2, kind: input, shape index: {}]   ;;  %s827_s3 = inlined_call_operand.vmem [shape: f32[1,128], index: 3, kind: input, shape index: {}]   ;;  %s828_s4 = inlined_call_operand.<no memory space> [shape: f32[1,1], index: 4, kind: input, shape index: {}]   ;;  %s829_s5 = inlined_call_operand.vmem [shape: f32[2,1], index: 5, kind: output, shape index: {}]  }
   0x1   :  { %v10_v0 = vstv %s828_s4 }
   0x2   :  { %11 = vst [vmem:[#allocation2] sm:$0x1] %v10_v0 }
   0x3   :  { %12 = vsyncpa [#allocation4], 0  ;;  %s723_s20 = smov [#allocation3]   ;;  %s699_s24 = scalar_lea.hbm %s825_s1, 1024 }
   0x4   :  { %s20_s21 = sshll.u32 %s723_s20, 4  ;;  %p700_p0 = scmp.ne.s32.totalorder %s825_s1, %s699_s24  ;;  %s21_s21 = int_to_ptr.vmem [resolvable:$true] %s20_s21 }
   0x5   :  { %p703_p1 = scmp.lt.u32.totalorder %s699_s24, %s825_s1 }
   0x7   :  { %p705_p2 = pnand %p703_p1, %p700_p0 }
   0x9   :  { %708 = shalt.err (!%p705_p2)
}
   0xa   :  { %s709_s4 = scalar_lea.vmem %s21_s21, 1024  ;;  %p714_p4 = scmp.lt.s32.totalorder %s21_s21, %s21_s21 }
   0xb   :  { %p710_p3 = scmp.ne.s32.totalorder %s21_s21, %s709_s4  ;;  %p715_p5 = scmp.lt.s32.totalorder %s709_s4, %s709_s4 }
   0xd   :  { %p716_p6 = por %p715_p5, %p714_p4 }
   0xf   :  { %p717_p7 = pnand %p716_p6, %p710_p3 }
  0x11   :  { %720 = shalt.err (!%p717_p7)
}
  0x12   :  { %s724_s29 = smov 64   ;;  %s725_s30 = smov 4  }
  0x13   :  { %26 = dma.hbm_to_vmem [thread:$0]  %s825_s1, 1024, %s21_s21, [#allocation4], %s724_s29, %s724_s29, %s725_s30  }
  0x14   :  { %721 = dma.done.wait [#allocation4], 1024  }
  0x15   :  { %722 = vsyncadd [#allocation4], 4294966272  ;;  %vm83_vm0 = vsmask.f32 6400  ;;  %v781_v1 = vld [vmem:[%s824_s0] sm:$0xff]   ;;  %v786_v2 = vld [vmem:[%s824_s0 + $0xc] sm:$0xff]   ;;  %v125_v38 = vlaneseq }
  0x16   :  { %v71_v3 = vrot.slane %v781_v1, 1  ;;  %v54_v4 = vshrl.u32 %v781_v1, 16  ;;  %v56_v5 = vshll.u32 %v781_v1, 16  ;;  %v691_v6 = vld [vmem:[#allocation3] sm:$0xff]   ;;  %v72_v7 = vrot.slane %v786_v2, 1  ;;  %v692_v14 = vld [vmem:[#allocation3 + $0x8] sm:$0xff]  }
  0x17   :  { %v61_v8 = vshrl.u32 %v786_v2, 16  ;;  %v63_v9 = vshll.u32 %v786_v2, 16  ;;  %v689_v10 = vld [vmem:[%s824_s0 + $0x14] ss:$0 sps:$4 sm:$0x11]   ;;  %659 = vmatprep.subr.bf16.mxu0 %v691_v6  ;;  %s726_s15 = smov 32  }
  0x18   :  { %73 = vrot.lane.b32.xlu1 %v71_v3, %s724_s29  ;;  %v58_v11 = vrot.slane %v56_v5, 1  ;;  %v84_v12 = vrot.slane %v54_v4, 1  ;;  %v85_v13 = vrot.slane %v56_v5, 2  ;;  %v96_v18 = vshll.u32 %v689_v10, 16  ;;  %660 = vmatpush3.bf16.msra.mxu0 %v691_v6  ;;  %v693_v21 = vld [vmem:[#allocation3 + $0x10] sm:$0xff]   ;;  %v694_v29 = vld [vmem:[#allocation3 + $0x18] sm:$0xff]  }
  0x19   :  { %v65_v15 = vrot.slane %v63_v9, 1  ;;  %v92_v16 = vrot.slane %v61_v8, 1  ;;  %v93_v17 = vrot.slane %v63_v9, 2  ;;  %v690_v20 = vld [vmem:[%s824_s0 + $0x8] ss:$0 sps:$4 sm:$0x11]   ;;  %661 = vmatprep.subr.bf16.mxu0 %v692_v14 }
  0x1a   :  { %v59_v19 = vor.u32 %v58_v11, %v54_v4  ;;  %v98_v23 = vrot.slane %v96_v18, 2  ;;  %v88_v25 = vshll.u32 %v690_v20, 16  ;;  %v86_v27 = vor.u32 %v85_v13, %v84_v12  ;;  %s727_s16 = smov 96   ;;  %v695_v31 = vld [vmem:[#allocation3 + $0x20] sm:$0xff]   ;;  %v696_v32 = vld [vmem:[#allocation3 + $0x28] sm:$0xff]   ;;  %v697_v33 = vld [vmem:[#allocation3 + $0x30] sm:$0xff]  }
  0x1b   :  { %v94_v22 = vor.u32 %v93_v17, %v92_v16  ;;  %v66_v24 = vor.u32 %v65_v15, %v61_v8  ;;  %v698_v34 = vld [vmem:[#allocation3 + $0x38] sm:$0xff]   ;;  %v728_v36 = vmov 1966171168   ;;  %v805_v42 = vshrl.u32 %v125_v38, 7 }
  0x1c   :  { %67 = vrot.lane.b32.xlu0 %v59_v19, %s726_s15  ;;  %75 = vrot.lane.b32.xlu1 %v72_v7, %s724_s29  ;;  %v90_v28 = vrot.slane %v88_v25, 2  ;;  %v123_v37 = vunpack.c.l.s4 %v728_v36  ;;  %vm104_vm1 = vcmask 261120   ;;  %vm114_vm2 = vcmask 785408  }
  0x1d   :  { %v99_v26 = vsel %vm83_vm0, %v94_v22, %v98_v23  ;;  %662 = vmatpush3.bf16.msra.mxu0 %v692_v14  ;;  %vm109_vm3 = vcmask 523264   ;;  %vm582_vm6 = vcmask 1045504   ;;  %vm611_vm7 = vcmask 1041409  }
  0x1e   :  { %663 = vmatprep.subr.bf16.mxu0 %v693_v21  ;;  %v91_v30 = vsel %vm83_vm0, %v86_v27, %v90_v28  ;;  %v124_v41 = vunpack.c.0.s8 %v123_v37  ;;  %v637_v37 = vld [vmem:[%s826_s2] ss:$0 sm:$0xff]  ;;  %vm614_vm8 = vcmask 1041408   ;;  %vm626_vm9 = vcmask 1024  }
  0x20   :  { %69 = vrot.lane.b32.xlu0 %v66_v24, %s726_s15  ;;  %102 = vrot.lane.b32.xlu1 %v99_v26, %s727_s16  ;;  %v127_v44 = vsub.s32 %v124_v41, %v805_v42 }
  0x21   :  { %664 = vmatpush3.bf16.msra.mxu0 %v693_v21 }
  0x22   :  { %665 = vmatprep.subr.bf16.mxu0 %v694_v29 }
  0x24   :  { %100 = vrot.lane.b32.xlu0 %v91_v30, %s727_s16 }
  0x25   :  { %666 = vmatpush3.bf16.msra.mxu0 %v694_v29 }
  0x26   :  { %667 = vmatprep.subr.bf16.mxu0 %v695_v31 }
  0x29   :  { %668 = vmatpush3.bf16.msra.mxu0 %v695_v31 }
  0x2a   :  { %669 = vmatprep.subr.bf16.mxu0 %v696_v32 }
  0x2d   :  { %670 = vmatpush3.bf16.msra.mxu0 %v696_v32 }
  0x2e   :  { %671 = vmatprep.subr.bf16.mxu0 %v697_v33 }
  0x31   :  { %672 = vmatpush3.bf16.msra.mxu0 %v697_v33 }
  0x32   :  { %673 = vmatprep.subr.bf16.mxu0 %v698_v34 }
  0x35   :  { %674 = vmatpush3.bf16.msra.mxu0 %v698_v34  ;;  %v729_v34 = vmov 1983009808  }
  0x8a   :  { %v74_v35 = vpop.permute.xlu1 %73 }
  0x8e   :  { %v68_v39 = vpop.permute.xlu0 %67  ;;  %v76_v40 = vpop.permute.xlu1 %75 }
  0x8f   :  { %v106_v46 = vsel %vm104_vm1, %v781_v1, %v68_v39 }
  0x90   :  { %v111_v52 = vsel %vm109_vm3, %v106_v46, %v74_v35  ;;  %v438_v35 = vunpack.c.l.s4 %v729_v34 }
  0x92   :  { %v70_v43 = vpop.permute.xlu0 %69  ;;  %v103_v45 = vpop.permute.xlu1 %102  ;;  %v439_v36 = vunpack.c.0.s8 %v438_v35 }
  0x93   :  { %v108_v47 = vsel %vm104_vm1, %v786_v2, %v70_v43 }
  0x94   :  { %v113_v48 = vsel %vm109_vm3, %v108_v47, %v76_v40  ;;  %v442_v41 = vsub.s32 %v439_v36, %v805_v42 }
  0x95   :  { %v118_v49 = vsel %vm114_vm2, %v113_v48, %v103_v45 }
  0x96   :  { %v169_v50 = vcombine.high %v118_v49, %v118_v49  ;;  %v176_v51 = vrot.slane %v118_v49, %v127_v44  ;;  %v101_v53 = vpop.permute.xlu0 %100 }
  0x97   :  { %v116_v54 = vsel %vm114_vm2, %v111_v52, %v101_v53 }
  0x98   :  { %v183_v55 = vrot.slane %v169_v50, %v127_v44  ;;  %v184_v56 = vcombine.high %v176_v51, %v176_v51  ;;  %v192_v57 = vrot.slane %v176_v51, %v127_v44  ;;  %v121_v58 = vcombine.high %v116_v54, %v116_v54 }
  0x99   :  { %v128_v59 = vrot.slane %v116_v54, %v127_v44 }
  0x9a   :  { %v185_v60 = vcombine.high %v183_v55, %v183_v55  ;;  %v199_v61 = vrot.slane %v183_v55, %v127_v44  ;;  %v206_v62 = vrot.slane %v184_v56, %v127_v44  ;;  %v214_v63 = vcombine.high %v192_v57, %v192_v57 }
  0x9b   :  { %v135_v0 = vrot.slane %v121_v58, %v127_v44  ;;  %v136_v1 = vcombine.high %v128_v59, %v128_v59  ;;  %v144_v7 = vrot.slane %v128_v59, %v127_v44 }
  0x9c   :  { %v213_v2 = vrot.slane %v185_v60, %v127_v44  ;;  %v215_v3 = vcombine.high %v199_v61, %v199_v61  ;;  %v216_v4 = vcombine.high %v206_v62, %v206_v62  ;;  %v289_v5 = vcombine.low %v206_v62, %v214_v63 }
  0x9d   :  { %v137_v6 = vcombine.high %v135_v0, %v135_v0  ;;  %v151_v8 = vrot.slane %v135_v0, %v127_v44  ;;  %v158_v9 = vrot.slane %v136_v1, %v127_v44 }
  0x9e   :  { %v290_v10 = vcombine.low %v216_v4, %v199_v61  ;;  %v291_v15 = vcombine.low %v213_v2, %v215_v3  ;;  %v298_v16 = vrot.slane %v289_v5, %v127_v44  ;;  %v497_v2 = vadd.s32 8, %v805_v42 }
  0x9f   :  { %v165_v11 = vrot.slane %v137_v6, %v127_v44  ;;  %v167_v12 = vcombine.high %v151_v8, %v151_v8  ;;  %v240_v13 = vcombine.low %v144_v7, %v158_v9  ;;  %v638_v14 = vcombine.high %v144_v7, %v158_v9 }
  0xa0   :  { %v305_v17 = vrot.slane %v290_v10, %v127_v44  ;;  %v312_v26 = vrot.slane %v291_v15, %v127_v44  ;;  %v730_v4 = vmov 13  }
  0xa1   :  { %v242_v18 = vcombine.low %v151_v8, %v165_v11  ;;  %v243_v19 = vcombine.low %v167_v12, %v192_v57  ;;  %v250_v20 = vrot.slane %v240_v13, %v127_v44  ;;  %v257_v21 = vrot.slane %v638_v14, %v127_v44 }
  0xa2   :  { %v313_v22 = vcombine.low %v298_v16, %v305_v17  ;;  %v327_v31 = vrot.slane %v312_v26, %v127_v44 }
  0xa3   :  { %v264_v23 = vrot.slane %v242_v18, %v127_v44  ;;  %v271_v24 = vrot.slane %v243_v19, %v127_v44  ;;  %v272_v25 = vcombine.low %v250_v20, %v257_v21 }
  0xa4   :  { %v320_v28 = vrot.slane %v313_v22, %v127_v44 }
  0xa5   :  { %v273_v27 = vcombine.low %v264_v23, %v271_v24  ;;  %v280_v29 = vrot.slane %v272_v25, %v127_v44 }
  0xa6   :  { %v328_v33 = vcombine.low %v320_v28, %v327_v31 }
  0xa7   :  { %v287_v30 = vrot.slane %v273_v27, %v127_v44  ;;  %v499_v44 = vand.u32 127, %v125_v38 }
  0xa9   :  { %v288_v32 = vcombine.low %v280_v29, %v287_v30  ;;  %vm500_vm4 = vcmp.lt.s32.totalorder %v499_v44, 50 }
  0xaa   :  { %v501_v5 = vsel %vm500_vm4, 14, %v730_v4 }
  0xab   :  { %675 = vmatprep.mubr.bf16.mxu0 %v288_v32  ;;  %vm503_vm5 = vcmp.lt.s32.totalorder %v497_v2, %v501_v5 }
  0xac   :  { %676 = vmatmul.mubr.bf16.vlgmr.msra.gmra.mrb[0].mxu0 %v328_v33 }
 0x17f   :  { %v677_v39 = vpop.f32.mrb[0].mxu0 }
 0x180   :  { %v422_v40 = vadd.f32 %v677_v39, %v637_v37  ;;  %v413_v43 = vpop.f32.mrb[1].mxu0 }
 0x181   :  { %v414_v45 = vadd.f32 %v637_v37, %v413_v43  ;;  %v678_v46 = vpop.f32.mrb[2].mxu0 }
 0x182   :  { %v430_v47 = vmax.f32 %v422_v40, 0.0  ;;  %v425_v48 = vadd.f32 %v678_v46, %v637_v37  ;;  %v416_v49 = vpop.f32.mrb[3].mxu0 }
 0x183   :  { %v428_v50 = vmax.f32 %v414_v45, 0.0  ;;  %v417_v51 = vadd.f32 %v637_v37, %v416_v49  ;;  %v647_v45 = vld [vmem:[%s827_s3] ss:$0 sm:$0xff] }
 0x184   :  { %v470_v52 = vcombine.high %v430_v47, %v430_v47  ;;  %v477_v53 = vrot.slane %v430_v47, %v442_v41  ;;  %v431_v54 = vmax.f32 %v425_v48, 0.0 }
 0x185   :  { %v436_v55 = vcombine.high %v428_v50, %v428_v50  ;;  %v443_v56 = vrot.slane %v428_v50, %v442_v41  ;;  %v429_v57 = vmax.f32 %v417_v51, 0.0 }
 0x186   :  { %v484_v58 = vrot.slane %v470_v52, %v442_v41  ;;  %v485_v59 = vcombine.high %v477_v53, %v477_v53  ;;  %v493_v60 = vrot.slane %v431_v54, %v442_v41  ;;  %v648_v52 = vld [vmem:[#allocation2] ss:$0 sm:$0xff] }
 0x187   :  { %v450_v61 = vrot.slane %v436_v55, %v442_v41  ;;  %v451_v62 = vcombine.high %v443_v56, %v443_v56  ;;  %v453_v63 = vcombine.high %v429_v57, %v429_v57  ;;  %v460_v0 = vrot.slane %v429_v57, %v442_v41 }
 0x188   :  { %v486_v38 = vcombine.high %v484_v58, %v484_v58  ;;  %v494_v1 = vcombine.high %v493_v60, %v493_v60  ;;  %v542_v8 = vcombine.low %v485_v59, %v484_v58 }
 0x189   :  { %v452_v3 = vcombine.high %v450_v61, %v450_v61  ;;  %v467_v6 = vrot.slane %v453_v63, %v442_v41  ;;  %v468_v7 = vcombine.high %v460_v0, %v460_v0  ;;  %v508_v10 = vcombine.low %v443_v56, %v451_v62 }
 0x18a   :  { %v558_v9 = vcombine.low %v486_v38, %v493_v60  ;;  %v572_v15 = vrot.slane %v494_v1, %v442_v41  ;;  %v556_v42 = vrot.slane %v542_v8, %v442_v41 }
 0x18b   :  { %v509_v11 = vcombine.low %v450_v61, %v452_v3  ;;  %v469_v12 = vcombine.high %v467_v6, %v467_v6  ;;  %v525_v13 = vcombine.low %v460_v0, %v468_v7  ;;  %v539_v18 = vrot.slane %v467_v6, %v442_v41 }
 0x18c   :  { %v565_v14 = vrot.slane %v558_v9, %v442_v41  ;;  %v516_v21 = vrot.slane %v508_v10, %v442_v41 }
 0x18d   :  { %v523_v16 = vrot.slane %v509_v11, %v442_v41  ;;  %v532_v17 = vrot.slane %v525_v13, %v442_v41  ;;  %v541_v19 = vcombine.low %v469_v12, %v477_v53 }
 0x18e   :  { %v573_v20 = vcombine.low %v565_v14, %v572_v15 }
 0x18f   :  { %v540_v22 = vcombine.low %v532_v17, %v539_v18  ;;  %v549_v23 = vrot.slane %v541_v19, %v442_v41  ;;  %v524_v25 = vcombine.low %v516_v21, %v523_v16 }
 0x190   :  { %v581_v24 = vsel %vm503_vm5, %v573_v20, -inf }
 0x191   :  { %v591_v26 = vsel %vm582_vm6, %v581_v24, -inf  ;;  %v557_v27 = vcombine.low %v549_v23, %v556_v42  ;;  %v579_v28 = vsel %vm503_vm5, %v540_v22, -inf }
 0x192   :  { %v583_v29 = vsel %vm582_vm6, %v579_v28, -inf }
 0x193   :  { %v584_v30 = vmax.f32 %v524_v25, %v583_v29  ;;  %v592_v31 = vmax.f32 %v557_v27, %v591_v26 }
 0x195   :  { %v585_v32 = vrot.slane %v584_v30, 4  ;;  %v593_v33 = vrot.slane %v592_v31, 4 }
 0x197   :  { %v586_v34 = vmax.f32 %v584_v30, %v585_v32  ;;  %v594_v35 = vmax.f32 %v592_v31, %v593_v33 }
 0x199   :  { %v587_v36 = vrot.slane %v586_v34, 2  ;;  %v595_v37 = vrot.slane %v594_v35, 2 }
 0x19b   :  { %v588_v39 = vmax.f32 %v586_v34, %v587_v36  ;;  %v596_v40 = vmax.f32 %v594_v35, %v595_v37 }
 0x19d   :  { %v589_v43 = vrot.slane %v588_v39, 1  ;;  %v597_v41 = vrot.slane %v596_v40, 1 }
 0x19f   :  { %v590_v46 = vmax.f32 %v588_v39, %v589_v43  ;;  %v598_v44 = vmax.f32 %v596_v40, %v597_v41 }
 0x1a1   :  { %v607_v47 = vmul.f32 %v647_v45, %v598_v44  ;;  %v606_v48 = vmul.f32 %v647_v45, %v590_v46 }
 0x1a3   :  { %v610_v49 = vrot.slane %v607_v47, 7 }
 0x1a5   :  { %v612_v50 = vsel %vm611_vm7, %v610_v49, %v606_v48 }
 0x1a6   :  { %v615_v51 = vsel %vm614_vm8, %v612_v50, 0.0 }
 0x1a7   :  { %616 = vadd.xlane.f32.xlu0 %v615_v51 }
 0x234   :  { %v617_v53 = vpop.xlane.xlu0 %616 }
 0x235   :  { %v625_v54 = vadd.f32 %v648_v52, %v617_v53 }
 0x237   :  { %627 = vst.msk [vmem:[%s829_s5] sm:$0x3] %vm626_vm9, %v625_v54 }
 0x238   :  { %632 = vsyncpa [#allocation4], 1 }

</bundles_post_ra>
